<compile_context>
chip_gen: v7x
topology: tpu7x:2x2x1
jax: 0.10.0
libtpu: 0.0.40
codegen_flags: <defaults>
</compile_context>

<pallas_src>
import jax
import jax.numpy as jnp
from jax.experimental import pallas as pl
from jax.experimental.pallas import tpu as pltpu


def _mask_kernel(idx_ref, mask_ref):
    # idx_ref:  (row_tile, fan_in)       int32, VMEM
    # mask_ref: (row_tile, in_features)  mask dtype, VMEM (full lane-dense rows)
    _, fan_in = idx_ref.shape
    in_features = mask_ref.shape[-1]

    # (1, in_features) column ids; stays sublane-replicated, so the compares
    # broadcast it for free instead of materializing a (rows, in_features)
    # int32 tile.  Full-row tiles => column offset is always 0 (no add).
    cols = jax.lax.broadcasted_iota(jnp.int32, (1, in_features), 1)

    idx = idx_ref[...]                                   # (rows, fan_in)

    # Unrolled fan_in accumulation in bool; single cast at the store.
    acc = idx[:, 0:1] == cols                            # (rows, in_features)
    for k in range(1, fan_in):
        acc = acc | (idx[:, k:k + 1] == cols)

    mask_ref[...] = acc.astype(mask_ref.dtype)


def _tiling(out_features, in_features, elem_bytes):
    """Pick (row_tile, vmem_limit_bytes) from the device's VMEM capacity."""
    # Physical VMEM per TensorCore (v5e/v6e: 128 MiB, v7x: 64 MiB).  Fall back
    # to the most conservative value if the query is unavailable.
    try:
        cap = getattr(pltpu.get_tpu_info(), "vmem_capacity_bytes", None)
    except Exception:  # pragma: no cover - CPU / interpret fallback
        cap = None
    if not cap:
        cap = 64 << 20

    # Per output buffer budget (Pallas double-buffers it): ~10 MiB on v7x,
    # ~21 MiB on v5e/v6e.  Big enough to amortize the ~0.35us per-grid-step
    # overhead, small enough that 2 buffers + the bool accumulator fit.
    per_buf = int(min(24 << 20, max(8 << 20, cap // 6)))
    vmem_limit = int(min(cap * 3 // 4, 2 * per_buf + (16 << 20)))

    if out_features <= 8:
        # Single tile equal to the full dim (always a legal block shape).
        return out_features, vmem_limit

    row_bytes = in_features * elem_bytes
    max_rows = max(8, (per_buf // max(row_bytes, 1)) // 8 * 8)

    # Keep at least 2 grid steps so both v7x TensorCores get work.
    half = ((out_features + 1) // 2 + 7) // 8 * 8
    max_rows = min(max_rows, max(8, half))

    rows_padded = (out_features + 7) // 8 * 8
    max_rows = min(max_rows, rows_padded)

    # Prefer a tile that divides out_features exactly (no masked edge block);
    # otherwise rely on Pallas' partial-block handling via the cdiv grid.
    for t in range(max_rows, 7, -8):
        if out_features % t == 0:
            return t, vmem_limit
    return max_rows, vmem_limit


def random_fixed_sparsity_mask_2d(indices, in_features, dtype=jnp.float32):
    """indices: (out_features, fan_in) int32 -> mask (out_features, in_features).

    dtype defaults to float32 to match the PyTorch Parameter; pass
    jnp.bfloat16 (or int8) to halve/quarter HBM writeback if consumers
    tolerate it.  Indices must be in [0, in_features) — no runtime OOB check
    on TPU (out-of-range values silently yield rows with fewer ones).
    """
    out_features, fan_in = indices.shape
    indices = indices.astype(jnp.int32)
    elem_bytes = jnp.dtype(dtype).itemsize

    row_tile, vmem_limit = _tiling(out_features, in_features, elem_bytes)
    grid = (pl.cdiv(out_features, row_tile),)

    cost = pl.CostEstimate(
        flops=2 * fan_in * out_features * in_features,
        transcendentals=0,
        bytes_accessed=out_features * in_features * elem_bytes
        + out_features * fan_in * 4,
    )

    return pl.pallas_call(
        _mask_kernel,
        out_shape=jax.ShapeDtypeStruct((out_features, in_features), dtype),
        grid_spec=pltpu.PrefetchScalarGridSpec(
            num_scalar_prefetch=0,
            grid=grid,
            in_specs=[pl.BlockSpec((row_tile, fan_in), lambda i: (i, 0))],
            out_specs=pl.BlockSpec((row_tile, in_features), lambda i: (i, 0)),
        ),
        compiler_params=pltpu.CompilerParams(
            dimension_semantics=("parallel",),
            vmem_limit_bytes=vmem_limit),
        cost_estimate=cost,
    )(indices)


def make_indices(key, in_features, out_features, fan_in, diagonal_mask=False):
    """JAX analogue of RandomFixedSparsityMask2D.reset_parameters() (default path)."""
    if diagonal_mask:
        assert fan_in == 1, "Diagonal mask only supported for fan-in 1"
        return jnp.arange(out_features, dtype=jnp.int32)[:, None]
    # TODO(synk): uniform_input_connectivity path (heapdict-based balancing) not ported.
    assert fan_in <= in_features, "fan_in must not exceed in_features"
    keys = jax.random.split(key, out_features)
    perms = jax.vmap(lambda k: jax.random.permutation(k, in_features))(keys)
    return perms[:, :fan_in].astype(jnp.int32)


if __name__ == "__main__":
    key = jax.random.PRNGKey(0)

    # Primary demo: lane-dense shapes (in_features multiple of 128).
    in_features, out_features, fan_in = 128, 64, 4
    indices = make_indices(key, in_features, out_features, fan_in)
    mask = jax.block_until_ready(random_fixed_sparsity_mask_2d(indices, in_features))

    assert mask.shape == (out_features, in_features)
    assert mask.dtype == jnp.float32
    assert bool(jnp.all(jnp.sum(mask, axis=1) == fan_in))
    row_ids = jnp.repeat(jnp.arange(out_features), fan_in)
    assert bool(jnp.all(mask[row_ids, indices.reshape(-1)] == 1.0))

    # Ragged shapes (out_features not a multiple of the row tile, in_features
    # not a multiple of 128) exercise the masked edge block.
    idx2 = make_indices(jax.random.PRNGKey(1), 96, 100, 3)
    m2 = jax.block_until_ready(random_fixed_sparsity_mask_2d(idx2, 96))
    assert m2.shape == (100, 96)
    assert bool(jnp.all(jnp.sum(m2, axis=1) == 3))
    r2 = jnp.repeat(jnp.arange(100), 3)
    assert bool(jnp.all(m2[r2, idx2.reshape(-1)] == 1.0))

    # bf16 output path (2x less HBM writeback than f32).
    m3 = jax.block_until_ready(
        random_fixed_sparsity_mask_2d(indices, in_features, dtype=jnp.bfloat16))
    assert m3.dtype == jnp.bfloat16
    assert bool(jnp.all(jnp.sum(m3.astype(jnp.float32), axis=1) == fan_in))

    # diagonal_mask path.
    diag_idx = make_indices(key, out_features, out_features, 1, diagonal_mask=True)
    diag = jax.block_until_ready(random_fixed_sparsity_mask_2d(diag_idx, out_features))
    assert bool(jnp.all(diag == jnp.eye(out_features, dtype=jnp.float32)))

    print("KERNEL_OK")
</pallas_src>

<mosaic_0001>
module attributes {stable_mosaic.version = 11 : i64} {
  func.func @_mask_kernel(%arg0: i32, %arg1: memref<32x4xi32, #tpu.memory_space<vmem>>, %arg2: memref<32x128xf32, #tpu.memory_space<vmem>>) attributes {dimension_semantics = [#tpu.dimension_semantics<parallel>], iteration_bounds = array<i64: 2>, scalar_prefetch = 0 : i64, scratch_operands = 0 : i64, tpu.core_type = #tpu.core_type<tc>, window_params = [{transform_indices = @transform_0, window_bounds = array<i64: 32, 4>}, {transform_indices = @transform_1, window_bounds = array<i64: 32, 128>}]} {
    %0 = tpu.iota {dimensions = array<i32: 1>} : vector<1x128xi32>
    %c0 = arith.constant 0 : index
    %c0_0 = arith.constant 0 : index
    %1 = vector.load %arg1[%c0, %c0_0] : memref<32x4xi32, #tpu.memory_space<vmem>>, vector<32x4xi32>
    %2 = vector.extract_strided_slice %1 {offsets = [0, 0], sizes = [32, 1], strides = [1, 1]} : vector<32x4xi32> to vector<32x1xi32>
    %3 = vector.broadcast %2 : vector<32x1xi32> to vector<32x128xi32>
    %4 = vector.broadcast %0 : vector<1x128xi32> to vector<32x128xi32>
    %5 = arith.cmpi eq, %3, %4 : vector<32x128xi32>
    %6 = vector.extract_strided_slice %1 {offsets = [0, 1], sizes = [32, 1], strides = [1, 1]} : vector<32x4xi32> to vector<32x1xi32>
    %7 = vector.broadcast %6 : vector<32x1xi32> to vector<32x128xi32>
    %8 = vector.broadcast %0 : vector<1x128xi32> to vector<32x128xi32>
    %9 = arith.cmpi eq, %7, %8 : vector<32x128xi32>
    %10 = arith.ori %5, %9 : vector<32x128xi1>
    %11 = vector.extract_strided_slice %1 {offsets = [0, 2], sizes = [32, 1], strides = [1, 1]} : vector<32x4xi32> to vector<32x1xi32>
    %12 = vector.broadcast %11 : vector<32x1xi32> to vector<32x128xi32>
    %13 = vector.broadcast %0 : vector<1x128xi32> to vector<32x128xi32>
    %14 = arith.cmpi eq, %12, %13 : vector<32x128xi32>
    %15 = arith.ori %10, %14 : vector<32x128xi1>
    %16 = vector.extract_strided_slice %1 {offsets = [0, 3], sizes = [32, 1], strides = [1, 1]} : vector<32x4xi32> to vector<32x1xi32>
    %17 = vector.broadcast %16 : vector<32x1xi32> to vector<32x128xi32>
    %18 = vector.broadcast %0 : vector<1x128xi32> to vector<32x128xi32>
    %19 = arith.cmpi eq, %17, %18 : vector<32x128xi32>
    %20 = arith.ori %15, %19 : vector<32x128xi1>
    %21 = arith.extui %20 : vector<32x128xi1> to vector<32x128xi32>
    %22 = arith.sitofp %21 : vector<32x128xi32> to vector<32x128xf32>
    %c0_1 = arith.constant 0 : index
    %c0_2 = arith.constant 0 : index
    %23 = vector.load %arg2[%c0_1, %c0_2] : memref<32x128xf32, #tpu.memory_space<vmem>>, vector<32x128xf32>
    tpu.vector_store %arg2[%c0_1, %c0_2], %22 {strides = array<i32>} : memref<32x128xf32, #tpu.memory_space<vmem>>, vector<32x128xf32>,
    return
  }
  func.func @transform_0(%arg0: i32) -> (i32, i32) {
    %c0_i32 = arith.constant 0 : i32
    %c0_i32_0 = arith.constant 0 : i32
    return %arg0, %c0_i32 : i32, i32
  }
  func.func @transform_1(%arg0: i32) -> (i32, i32) {
    %c0_i32 = arith.constant 0 : i32
    %c0_i32_0 = arith.constant 0 : i32
    return %arg0, %c0_i32 : i32, i32
  }
}

</mosaic_0001>

<bundles_post_ra>
// kernel: tpu_custom_call.1
= control target key start
LH: loop header
LB: loop body
LE: loop exit
PB: predicated region body
PF: predicated region fallthrough
CT: control target
= control target key end

     0   :  { %6 = vsyncpa [#allocation3], 0  ;;  %s554_s0 = inlined_call_operand.vmem [shape: s32[64,4], index: 0, kind: input, shape index: {}]   ;;  %s555_s1 = inlined_call_operand.hbm [shape: f32[64,128], index: 1, kind: output, shape index: {}]  }
   0x1   :  { %8 = vsyncpa [#allocation3 + $0x1], 0  ;;  %s441_s6 = smov 0   ;;  %s443_s7 = smov 0  }
   0x2   :  { %s445_s8 = smov 0   ;;  %s447_s9 = smov 0  }
   0x3 LB: > { %s462_s10 = sadd.s32 4294967295, %s421_s9   ;;  %s288_s11 = sadd.s32 4294967294, %s421_s9   ;;  %s421_s9 = sphi %s447_s9, %s561_s9   ;;  %s417_s8 = sphi %s445_s8, %s560_s8   ;;  %s413_s7 = sphi %s443_s7, %s559_s7   ;;  %s409_s6 = sphi %s441_s6, %s558_s6  }
   0x4   : > { %s466_s12 = sadd.s32 1, %s421_s9   ;;  %s47_s13 = sadd.s32 1, %s417_s8 }
   0x5   : > { %s44_s14 = ssub.s32 %s421_s9, %s466_s12  ;;  %p57_p0 = scmp.ne.s32.totalorder %s417_s8, %s413_s7 }
   0x6   : > { %p45_p1 = scmp.eq.s32.totalorder %s44_s14, 0  ;;  %p58_p2 = scmp.eq.s32.totalorder %s462_s10, 1 }
   0x7   : > { %p63_p3 = scmp.ne.s32.totalorder %s413_s7, %s409_s6  ;;  %p64_p4 = scmp.eq.s32.totalorder %s288_s11, 1 }
   0x8   : > { %s477_s15 = scalar_select %p45_p1, %s417_s8, %s47_s13  }
   0x9   : > { %p479_p5 = por %p58_p2, %p57_p0  ;;  %p483_p6 = por %p64_p4, %p63_p3 }
   0xa   : > { %p291_p7 = scmp.ge.s32.totalorder %s421_s9, 1  ;;  %p91_p8 = scmp.lt.s32.totalorder %s421_s9, 3 }
   0xc   : > { %p92_p9 = pnand %p291_p7, %p91_p8 }
   0xd   : > { %s293_s18 = sshll.u32 (!%p92_p9), %s462_s10, 2  ;;  %v423_v0 = vmov (!%p92_p9), 0   ;;  %v424_v5 = vmov (!%p92_p9), 1   ;;  %v425_v6 = vmov (!%p92_p9), 2   ;;  %v426_v7 = vmov (!%p92_p9), 3   ;;  %s108_s23 = sand.u32 (!%p92_p9), 1, %s413_s7  }
   0xe   : > { %95 = sbr.rel (%p92_p9) target bundleno = 206 (0xce), region = 24  ;;  %352 = vset.pattern.permute.xlu1 (!%p92_p9), %v423_v0  ;;  %351 = vset.pattern.permute.xlu0 (!%p92_p9), %v423_v0  ;;  %p112_p10 = scmp.lt.s32.totalorder (!%p92_p9), %s293_s18, 7  ;;  %v118_v16 = vlaneseq (!%p92_p9)  ;;  %v427_v22 = vmov (!%p92_p9), 0.0  }
   0xf   : > { %s292_s24 = sshll.u32 (!%p92_p9), %s108_s23, 5  ;;  %s304_s27 = sshll.u32 (!%p92_p9), %s462_s10, 9 }
  0x10   : > { %v119_v17 = vand.u32 (!%p92_p9), 127, %v118_v16  ;;  %s496_s25 = scalar_lea.vmem (!%p92_p9), [#allocation2], %s292_s24  ;;  %s508_s30 = scalar_lea.hbm (!%p92_p9), %s555_s1, %s304_s27 }
  0x11   : > { %s226_s26 = sshll.u32 (!%p92_p9), %s496_s25, 4  ;;  %s513_s2 = scalar_lea.sflag (!%p92_p9), [#allocation3], %s108_s23  ;;  %s503_s26 = int_to_ptr.vmem [resolvable:$true] %s226_s26 }
  0x12   : > { %s359_s3 = scalar_lea.vmem (!%p92_p9), %s503_s26, 512  ;;  %s428_s4 = smov (!%p92_p9), [#allocation2]  }
  0x13   : > { %p360_p11 = scmp.ne.s32.totalorder (!%p92_p9), %s503_s26, %s359_s3  ;;  %s363_s5 = sshll.u32 (!%p92_p9), %s428_s4, 4  ;;  %s364_s5 = int_to_ptr.vmem [resolvable:$false] %s363_s5 }
  0x14   : > { %s365_s10 = scalar_lea.vmem (!%p92_p9), %s364_s5, 1024  ;;  %p366_p0 = scmp.lt.s32.totalorder (!%p92_p9), %s503_s26, %s364_s5 }
  0x15   : > { %s563_s18 = smov (!%p112_p10, %s293_s18), 7  ;;  %p361_p12 = pnand %p360_p11, %p479_p5 }
  0x16   : > { %s294_s19 = sshll.u32 %s563_s18, 3  ;;  %p367_p1 = scmp.lt.s32.totalorder %s365_s10, %s359_s3 }
  0x17   : > { %s115_s22 = scalar_lea.vmem %s554_s0, %s294_s19  ;;  %p362_p13 = pneg %p361_p12 }
  0x18   : > { %v122_v1 = vld [vmem:[%s115_s22 + $0x10] sm:$0xff]  ;;  %v120_v2 = vld [vmem:[%s115_s22] sm:$0xff]  ;;  %v123_v3 = vld [vmem:[%s115_s22 + $0x18] sm:$0xff]  ;;  %p368_p2 = por %p367_p1, %p366_p0 }
  0x19   : > { %131 = vperm.xlu1 %352, %v122_v1   ;;  %125 = vperm.xlu0 %351, %v120_v2   ;;  %v121_v4 = vld [vmem:[%s115_s22 + $0x8] sm:$0xff] }
  0x1a   : > { %p369_p3 = pnand %p368_p2, %p362_p13 }
  0x1d   : > { %134 = vperm.xlu1 %352, %v123_v3   ;;  %128 = vperm.xlu0 %351, %v121_v4  }
  0x21   : > { %354 = vset.pattern.permute.xlu1 %v424_v5  ;;  %353 = vset.pattern.permute.xlu0 %v424_v5 }
  0x22   : > { %144 = vperm.xlu1 %354, %v121_v4   ;;  %141 = vperm.xlu0 %353, %v120_v2  }
  0x26   : > { %147 = vperm.xlu1 %354, %v122_v1   ;;  %150 = vperm.xlu0 %353, %v123_v3  }
  0x2a   : > { %355 = vset.pattern.permute.xlu1 %v425_v6  ;;  %356 = vset.pattern.permute.xlu0 %v425_v6 }
  0x2b   : > { %161 = vperm.xlu1 %355, %v120_v2   ;;  %164 = vperm.xlu0 %356, %v121_v4  }
  0x2f   : > { %167 = vperm.xlu1 %355, %v122_v1   ;;  %357 = vset.pattern.permute.xlu0 %v426_v7 }
  0x30   : > { %181 = vperm.xlu0 %357, %v120_v2  }
  0x33   : > { %170 = vperm.xlu1 %355, %v123_v3  }
  0x34   : > { %190 = vperm.xlu0 %357, %v123_v3  }
  0x37   : > { %358 = vset.pattern.permute.xlu1 %v426_v7 }
  0x38   : > { %184 = vperm.xlu1 %358, %v121_v4  }
  0x3c   : > { %187 = vperm.xlu1 %358, %v122_v1  }
  0x98   : > { %v132_v8 = vpop.permute.xlu1 %131  ;;  %v126_v9 = vpop.permute.xlu0 %125 }
  0x99   : > { %vm136_vm0 = vcmp.eq.s32.totalorder %v126_v9, %v119_v17 }
  0x9c   : > { %v135_v10 = vpop.permute.xlu1 %134  ;;  %v129_v11 = vpop.permute.xlu0 %128 }
  0x9d   : > { %vm139_vm8 = vcmp.eq.s32.totalorder %v135_v10, %v119_v17  ;;  %vm137_vm11 = vcmp.eq.s32.totalorder %v129_v11, %v119_v17 }
  0xa1   : > { %v145_v12 = vpop.permute.xlu1 %144  ;;  %v142_v13 = vpop.permute.xlu0 %141 }
  0xa2   : > { %vm152_vm1 = vcmp.eq.s32.totalorder %v142_v13, %v119_v17  ;;  %vm153_vm12 = vcmp.eq.s32.totalorder %v145_v12, %v119_v17 }
  0xa3   : > { %vm156_vm3 = vmor %vm136_vm0, %vm152_vm1 }
  0xa4   : > { %vm157_vm1 = vmor %vm137_vm11, %vm153_vm12 }
  0xa5   : > { %v148_v14 = vpop.permute.xlu1 %147  ;;  %v151_v15 = vpop.permute.xlu0 %150 }
  0xa6   : > { %vm155_vm4 = vcmp.eq.s32.totalorder %v151_v15, %v119_v17 }
  0xa7   : > { %vm159_vm9 = vmor %vm139_vm8, %vm155_vm4 }
  0xaa   : > { %v162_v18 = vpop.permute.xlu1 %161  ;;  %v165_v19 = vpop.permute.xlu0 %164 }
  0xab   : > { %vm172_vm2 = vcmp.eq.s32.totalorder %v162_v18, %v119_v17  ;;  %vm173_vm15 = vcmp.eq.s32.totalorder %v165_v19, %v119_v17 }
  0xac   : > { %vm176_vm5 = vmor %vm156_vm3, %vm172_vm2  ;;  %vm154_vm2 = vcmp.eq.s32.totalorder %v148_v14, %v119_v17 }
  0xad   : > { %vm177_vm3 = vmor %vm157_vm1, %vm173_vm15 }
  0xae   : > { %v168_v20 = vpop.permute.xlu1 %167 }
  0xaf   : > { %v182_v21 = vpop.permute.xlu0 %181 }
  0xb0   : > { %vm192_vm6 = vcmp.eq.s32.totalorder %v182_v21, %v119_v17 }
  0xb1   : > { %vm196_vm7 = vmor %vm176_vm5, %vm192_vm6  ;;  %vm174_vm5 = vcmp.eq.s32.totalorder %v168_v20, %v119_v17 }
  0xb2   : > { %v295_v23 = vsel %vm196_vm7, 1.0, %v427_v22  ;;  %v171_v24 = vpop.permute.xlu1 %170  ;;  %vm138_vm7 = vcmp.eq.s32.totalorder %v132_v8, %v119_v17 }
  0xb3   : > { %208 = vst [vmem:[%s496_s25] sm:$0xff] %v295_v23  ;;  %vm175_vm10 = vcmp.eq.s32.totalorder %v171_v24, %v119_v17  ;;  %v191_v25 = vpop.permute.xlu0 %190  ;;  %vm158_vm8 = vmor %vm138_vm7, %vm154_vm2 }
  0xb4   : > { %vm179_vm13 = vmor %vm159_vm9, %vm175_vm10  ;;  %vm195_vm14 = vcmp.eq.s32.totalorder %v191_v25, %v119_v17 }
  0xb5   : > { %vm199_vm0 = vmor %vm179_vm13, %vm195_vm14 }
  0xb6   : > { %v298_v26 = vsel %vm199_vm0, 1.0, %v427_v22  ;;  %vm178_vm9 = vmor %vm158_vm8, %vm174_vm5 }
  0xb7   : > { %211 = vst [vmem:[%s496_s25 + $0x18] sm:$0xff] %v298_v26  ;;  %v185_v27 = vpop.permute.xlu1 %184 }
  0xb8   : > { %vm193_vm4 = vcmp.eq.s32.totalorder %v185_v27, %v119_v17 }
  0xb9   : > { %vm197_vm6 = vmor %vm177_vm3, %vm193_vm4 }
  0xba   : > { %v296_v28 = vsel %vm197_vm6, 1.0, %v427_v22 }
  0xbb   : > { %209 = vst [vmem:[%s496_s25 + $0x8] sm:$0xff] %v296_v28  ;;  %v188_v29 = vpop.permute.xlu1 %187 }
  0xbc   : > { %vm194_vm10 = vcmp.eq.s32.totalorder %v188_v29, %v119_v17 }
  0xbd   : > { %vm198_vm11 = vmor %vm178_vm9, %vm194_vm10 }
  0xbe   : > { %v297_v30 = vsel %vm198_vm11, 1.0, %v427_v22 }
  0xbf   : > { %210 = vst [vmem:[%s496_s25 + $0x10] sm:$0xff] %v297_v30 }
  0xc0   : > { %372 = shalt.err (!%p369_p3)
}
  0xc1   : > { %s373_s11 = scalar_lea.hbm %s508_s30, 512  ;;  %s377_s18 = scalar_lea.hbm %s555_s1, 1024 }
  0xc2   : > { %p374_p4 = scmp.ne.s32.totalorder %s508_s30, %s373_s11  ;;  %p378_p9 = scmp.lt.u32.totalorder %s508_s30, %s555_s1 }
  0xc3   : > { %p379_p10 = scmp.lt.u32.totalorder %s377_s18, %s373_s11  ;;  %p381_p12 = scmp.lt.u32.totalorder %s373_s11, %s508_s30 }
  0xc4   : > { %p375_p7 = pnand %p374_p4, %p479_p5 }
  0xc5   : > { %p380_p11 = por %p379_p10, %p378_p9 }
  0xc6   : > { %p376_p8 = pneg %p375_p7 }
  0xc7   : > { %p382_p13 = por %p381_p12, %p380_p11 }
  0xc9   : > { %p383_p0 = pnand %p382_p13, %p376_p8 }
  0xcb   : > { %386 = shalt.err (!%p383_p0)
}
  0xcc   : > { %s429_s21 = smov 128   ;;  %s430_s22 = smov 8  }
  0xcd   : > { %305 = dma.vmem_to_hbm [thread:$0]  (%p479_p5), %s503_s26, 512, %s508_s30, %s513_s2, %s429_s21, %s429_s21, %s430_s22  }
  0xce PF: > { %p311_p1 = scmp.ge.s32.totalorder %s421_s9, 2  ;;  %s241_s23 = sand.u32 1, %s409_s6  }
  0xcf   : > { %s242_s24 = scalar_lea.sflag [#allocation3], %s241_s23 }
  0xd0   : > { %p308_p2 = pnand %p311_p1, %p483_p6 }
  0xd2   : > { %404 = dma.done.wait (!%p308_p2), %s242_s24, 512  }
  0xd3   : > { %406 = vsyncadd (!%p308_p2), %s242_s24, 4294966784  ;;  %p11_p3 = scmp.ge.s32.totalorder %s466_s12, 4   ;;  %s558_s6 = smov %s413_s7 }
  0xd4   : > { %s559_s7 = smov %s417_s8  ;;  %s560_s8 = smov %s477_s15 }
  0xd5   : > { %s561_s9 = smov %s466_s12  ;;  %13 = sbr.rel (!%p11_p3) target bundleno = 3 (0x3), region = 59 }
  0xdc   :  { %247 = vsyncpa [#allocation3], 1 }
  0xdd   :  { %249 = vsyncpa [#allocation3 + $0x1], 1 }

</bundles_post_ra>
